<compile_context>
chip_gen: v5e
topology: v5e:2x2
jax: 0.10.0
libtpu: 0.0.40
codegen_flags: <defaults>
</compile_context>

<pallas_src>
import math

import jax
import jax.numpy as jnp
from jax import lax
from jax.experimental import pallas as pl
from jax.experimental.pallas import tpu as pltpu

VERY_SMALL_NUMBER = 1e-12


def _round_up(v, m):
    return ((v + m - 1) // m) * m


# ---------------------------------------------------------------------------
# Pass 1: accumulate anchor_x = adj^T @ x and col_sum over N tiles, then emit
#         anchor_feat = anchor_x @ W and inv_col_sum.
# ---------------------------------------------------------------------------
def anchor_aggregate_kernel(adj_ref, x_ref, w_ref,       # inputs  (bf16 tiles)
                            af_ref, ics_ref,             # outputs ([A,out] bf16, [1,A] f32)
                            ax_acc, cs_acc):             # VMEM scratch (f32)
    i = pl.program_id(0)

    @pl.when(i == 0)
    def _init():
        ax_acc[...] = jnp.zeros_like(ax_acc)
        cs_acc[...] = jnp.zeros_like(cs_acc)

    adj = adj_ref[...]                                   # [TN, A]  bf16
    x = x_ref[...]                                       # [TN, in] bf16

    # anchor_x += adj^T @ x  (contract the node axis; MXU, f32 accumulate).
    ax_acc[...] += lax.dot_general(
        adj, x,
        dimension_numbers=(((0,), (0,)), ((), ())),
        preferred_element_type=jnp.float32)              # [A, in] f32

    # col_sum += sum over the nodes of this tile (f32, sublane reduction).
    cs_acc[...] += jnp.sum(adj.astype(jnp.float32), axis=0, keepdims=True)  # [1, A]

    @pl.when(i == pl.num_programs(0) - 1)
    def _finalize():
        # Tiny [A,in] @ [in,out] matmul, done once, in f32 for accuracy.
        af = jnp.dot(ax_acc[...], w_ref[...].astype(jnp.float32),
                     preferred_element_type=jnp.float32)
        af_ref[...] = af.astype(af_ref.dtype)
        # 1 / clamp(col_sum, eps): EUP approx reciprocal, kept in f32.
        ics_ref[...] = pl.reciprocal(
            jnp.maximum(cs_acc[...], VERY_SMALL_NUMBER), approx=True)


# ---------------------------------------------------------------------------
# Pass 2: out_tile = ((adj_tile * inv_col_sum) @ anchor_feat) * inv_row_sum_tile
# ---------------------------------------------------------------------------
def anchor_scatter_kernel(adj_ref, af_ref, ics_ref, o_ref):
    adj = adj_ref[...]                                   # [TN, A] bf16
    inv_cs = ics_ref[...].astype(jnp.bfloat16)           # [1, A]

    # Fold the column normalization into the adj tile (lane-broadcast multiply).
    adj_n = adj * inv_cs                                 # [TN, A] bf16

    # Row sums for the anchor->node normalization (f32 lane reduction).
    row_sum = jnp.sum(adj.astype(jnp.float32), axis=1, keepdims=True)       # [TN, 1]
    inv_rs = pl.reciprocal(jnp.maximum(row_sum, VERY_SMALL_NUMBER), approx=True)

    out = jnp.dot(adj_n, af_ref[...],
                  preferred_element_type=jnp.float32)    # [TN, out] f32

    o_ref[...] = (out * inv_rs).astype(o_ref.dtype)


# ---------------------------------------------------------------------------
# Wrapper
# ---------------------------------------------------------------------------
def anchor_gcn_layer(x, weight, adj, *, block_n=512,
                     compute_dtype=jnp.bfloat16,
                     vmem_limit_bytes=32 * 1024 * 1024):
    """AnchorGCNLayer forward. x: [N, in], weight: [in, out], adj: [N, A]."""
    n, in_f = x.shape
    in_f_w, out_f = weight.shape
    n_adj, a = adj.shape
    assert in_f == in_f_w and n == n_adj

    f32 = jnp.float32

    # Lane-dense padding of the anchor and output-feature axes.
    a_p = _round_up(a, 128)
    out_p = _round_up(out_f, 128)

    # Node-axis tiling.  (On v7x, shrink block_n if feature dims are huge so
    # double-buffered tiles stay well under the 64 MiB VMEM ceiling.)
    block_n = max(8, min(block_n, _round_up(n, 8)))
    block_n = _round_up(block_n, 8)
    n_p = _round_up(n, block_n)
    grid_n = n_p // block_n

    # Zero-pad (padded rows/cols contribute nothing) and cast MXU operands to bf16.
    x_p = jnp.pad(x, ((0, n_p - n), (0, 0))).astype(compute_dtype)
    adj_p = jnp.pad(adj, ((0, n_p - n), (0, a_p - a))).astype(compute_dtype)
    w_p = jnp.pad(weight, ((0, 0), (0, out_p - out_f))).astype(compute_dtype)

    # ---------------- pass 1: anchor aggregation (reduction over N tiles) ----
    af_raw, inv_cs = pl.pallas_call(
        anchor_aggregate_kernel,
        out_shape=(jax.ShapeDtypeStruct((a_p, out_p), compute_dtype),
                   jax.ShapeDtypeStruct((1, a_p), f32)),
        grid_spec=pltpu.PrefetchScalarGridSpec(
            num_scalar_prefetch=0,
            grid=(grid_n,),
            in_specs=[
                pl.BlockSpec((block_n, a_p), lambda i: (i, 0)),   # adj tile
                pl.BlockSpec((block_n, in_f), lambda i: (i, 0)),  # x tile
                pl.BlockSpec((in_f, out_p), lambda i: (0, 0)),    # W (resident)
            ],
            out_specs=[
                pl.BlockSpec((a_p, out_p), lambda i: (0, 0)),
                pl.BlockSpec((1, a_p), lambda i: (0, 0)),
            ],
            scratch_shapes=[
                pltpu.VMEM((a_p, in_f), f32),   # anchor_x accumulator
                pltpu.VMEM((1, a_p), f32),      # col_sum accumulator
            ]),
        compiler_params=pltpu.CompilerParams(
            dimension_semantics=("arbitrary",),
            vmem_limit_bytes=vmem_limit_bytes),
        cost_estimate=pl.CostEstimate(
            flops=2 * n_p * a_p * in_f + 2 * a_p * in_f * out_p + n_p * a_p,
            transcendentals=a_p,
            bytes_accessed=(n_p * a_p + n_p * in_f + in_f * out_p) * 2
                           + a_p * out_p * 2 + a_p * 4),
    )(adj_p, x_p, w_p)

    # ---------------- pass 2: scatter back to nodes (parallel over N tiles) ---
    out_padded = pl.pallas_call(
        anchor_scatter_kernel,
        out_shape=jax.ShapeDtypeStruct((n_p, out_p), f32),
        grid_spec=pltpu.PrefetchScalarGridSpec(
            num_scalar_prefetch=0,
            grid=(grid_n,),
            in_specs=[
                pl.BlockSpec((block_n, a_p), lambda i: (i, 0)),   # adj tile
                pl.BlockSpec((a_p, out_p), lambda i: (0, 0)),     # anchor_feat
                pl.BlockSpec((1, a_p), lambda i: (0, 0)),         # inv_col_sum
            ],
            out_specs=pl.BlockSpec((block_n, out_p), lambda i: (i, 0)),
        ),
        compiler_params=pltpu.CompilerParams(
            dimension_semantics=("parallel",),
            vmem_limit_bytes=vmem_limit_bytes),
        cost_estimate=pl.CostEstimate(
            flops=2 * n_p * a_p * out_p + n_p * a_p,
            transcendentals=n_p,
            bytes_accessed=n_p * a_p * 2 + a_p * out_p * 2
                           + a_p * 4 + n_p * out_p * 4),
    )(adj_p, af_raw, inv_cs)

    return out_padded[:n, :out_f]


# ---------------------------------------------------------------------------
# Helpers / reference
# ---------------------------------------------------------------------------
def xavier_uniform(key, shape, dtype=jnp.float32):
    fan_in, fan_out = shape
    limit = math.sqrt(6.0 / (fan_in + fan_out))
    return jax.random.uniform(key, shape, dtype=dtype, minval=-limit, maxval=limit)


def reference(x, weight, adj):
    support = x @ weight
    node_norm = adj / jnp.maximum(jnp.sum(adj, axis=-2, keepdims=True), VERY_SMALL_NUMBER)
    anchor_norm = adj / jnp.maximum(jnp.sum(adj, axis=-1, keepdims=True), VERY_SMALL_NUMBER)
    return anchor_norm @ (node_norm.T @ support)


if __name__ == "__main__":
    key = jax.random.PRNGKey(0)

    def run_case(case_key, n, a, in_f, out_f, block_n):
        k_x, k_w, k_adj = jax.random.split(case_key, 3)
        x = jax.random.normal(k_x, (n, in_f), dtype=jnp.float32)
        weight = xavier_uniform(k_w, (in_f, out_f))          # nn.init.xavier_uniform_
        # Non-negative node-anchor adjacency (attention-style weights).
        adj = jax.nn.relu(jax.random.normal(k_adj, (n, a), dtype=jnp.float32))

        out = anchor_gcn_layer(x, weight, adj, block_n=block_n)
        out = jax.block_until_ready(out)

        ref = reference(x, weight, adj)
        assert out.shape == ref.shape
        # bf16 MXU operands -> loosened tolerance vs. the f32 reference.
        assert jnp.allclose(out, ref, atol=5e-2, rtol=5e-2), (
            f"mismatch vs reference, max abs diff {jnp.max(jnp.abs(out - ref))}")

    k1, k2 = jax.random.split(key)
    # Lane-dense case: exercises the 2-tile reduction sweep + parallel output sweep.
    run_case(k1, n=256, a=128, in_f=128, out_f=128, block_n=128)
    # Ragged case: exercises node / anchor / output-feature zero-padding.
    run_case(k2, n=200, a=96, in_f=64, out_f=96, block_n=128)

    print("KERNEL_OK")
</pallas_src>

<mosaic_0001>
module attributes {stable_mosaic.version = 11 : i64} {
  func.func @anchor_aggregate_kernel(%arg0: i32, %arg1: memref<128x128xbf16, #tpu.memory_space<vmem>>, %arg2: memref<128x128xbf16, #tpu.memory_space<vmem>>, %arg3: memref<128x128xbf16, #tpu.memory_space<vmem>>, %arg4: memref<128x128xbf16, #tpu.memory_space<vmem>>, %arg5: memref<1x128xf32, #tpu.memory_space<vmem>>, %arg6: memref<128x128xf32, #tpu.memory_space<vmem>>, %arg7: memref<1x128xf32, #tpu.memory_space<vmem>>) attributes {dimension_semantics = [#tpu.dimension_semantics<arbitrary>], iteration_bounds = array<i64: 2>, scalar_prefetch = 0 : i64, scratch_operands = 2 : i64, tpu.core_type = #tpu.core_type<tc>, window_params = [{transform_indices = @transform_0, window_bounds = array<i64: 128, 128>}, {transform_indices = @transform_1, window_bounds = array<i64: 128, 128>}, {pipeline_mode = #tpu.pipeline_mode<synchronous>, transform_indices = @transform_2, window_bounds = array<i64: 128, 128>}, {pipeline_mode = #tpu.pipeline_mode<synchronous>, transform_indices = @transform_3, window_bounds = array<i64: 128, 128>}, {pipeline_mode = #tpu.pipeline_mode<synchronous>, transform_indices = @transform_4, window_bounds = array<i64: 1, 128>}]} {
    %c0_i32 = arith.constant 0 : i32
    %0 = arith.cmpi eq, %arg0, %c0_i32 : i32
    %1 = arith.extui %0 : i1 to i32
    %c0_i32_0 = arith.constant 0 : i32
    %2 = arith.cmpi ne, %1, %c0_i32_0 : i32
    scf.if %2 {
      %cst_14 = arith.constant 0.000000e+00 : f32
      %18 = vector.broadcast %cst_14 : f32 to vector<128x128xf32>
      %c0_15 = arith.constant 0 : index
      %c0_16 = arith.constant 0 : index
      %19 = vector.load %arg6[%c0_15, %c0_16] : memref<128x128xf32, #tpu.memory_space<vmem>>, vector<128x128xf32>
      tpu.vector_store %arg6[%c0_15, %c0_16], %18 {strides = array<i32>} : memref<128x128xf32, #tpu.memory_space<vmem>>, vector<128x128xf32>,
      %cst_17 = arith.constant 0.000000e+00 : f32
      %20 = vector.broadcast %cst_17 : f32 to vector<1x128xf32>
      %c0_18 = arith.constant 0 : index
      %c0_19 = arith.constant 0 : index
      %21 = vector.load %arg7[%c0_18, %c0_19] : memref<1x128xf32, #tpu.memory_space<vmem>>, vector<1x128xf32>
      tpu.vector_store %arg7[%c0_18, %c0_19], %20 {strides = array<i32>} : memref<1x128xf32, #tpu.memory_space<vmem>>, vector<1x128xf32>,
    } else {
    }
    %c0 = arith.constant 0 : index
    %c0_1 = arith.constant 0 : index
    %3 = vector.load %arg1[%c0, %c0_1] : memref<128x128xbf16, #tpu.memory_space<vmem>>, vector<128x128xbf16>
    %c0_2 = arith.constant 0 : index
    %c0_3 = arith.constant 0 : index
    %4 = vector.load %arg2[%c0_2, %c0_3] : memref<128x128xbf16, #tpu.memory_space<vmem>>, vector<128x128xbf16>
    %c0_4 = arith.constant 0 : index
    %c0_5 = arith.constant 0 : index
    %5 = vector.load %arg6[%c0_4, %c0_5] : memref<128x128xf32, #tpu.memory_space<vmem>>, vector<128x128xf32>
    %cst = arith.constant dense<0.000000e+00> : vector<128x128xf32>
    %6 = tpu.matmul %3, %4, %cst {dimension_numbers = #tpu.dot_dimension_numbers<[0], [0], [1], [1], [0, 1, 1, 1], [], []>} : vector<128x128xbf16>, vector<128x128xbf16>, vector<128x128xf32> -> vector<128x128xf32>
    %7 = arith.addf %5, %6 : vector<128x128xf32>
    %c0_6 = arith.constant 0 : index
    %c0_7 = arith.constant 0 : index
    %8 = vector.load %arg6[%c0_6, %c0_7] : memref<128x128xf32, #tpu.memory_space<vmem>>, vector<128x128xf32>
    tpu.vector_store %arg6[%c0_6, %c0_7], %7 {strides = array<i32>} : memref<128x128xf32, #tpu.memory_space<vmem>>, vector<128x128xf32>,
    %c0_8 = arith.constant 0 : index
    %c0_9 = arith.constant 0 : index
    %9 = vector.load %arg7[%c0_8, %c0_9] : memref<1x128xf32, #tpu.memory_space<vmem>>, vector<1x128xf32>
    %10 = arith.extf %3 : vector<128x128xbf16> to vector<128x128xf32>
    %cst_10 = arith.constant dense<0.000000e+00> : vector<128xf32>
    %11 = vector.multi_reduction <add>, %10, %cst_10 [0] : vector<128x128xf32> to vector<128xf32>
    %12 = vector.shape_cast %11 : vector<128xf32> to vector<1x128xf32>
    %13 = arith.addf %9, %12 : vector<1x128xf32>
    %c0_11 = arith.constant 0 : index
    %c0_12 = arith.constant 0 : index
    %14 = vector.load %arg7[%c0_11, %c0_12] : memref<1x128xf32, #tpu.memory_space<vmem>>, vector<1x128xf32>
    tpu.vector_store %arg7[%c0_11, %c0_12], %13 {strides = array<i32>} : memref<1x128xf32, #tpu.memory_space<vmem>>, vector<1x128xf32>,
    %c1_i32 = arith.constant 1 : i32
    %15 = arith.cmpi eq, %arg0, %c1_i32 : i32
    %16 = arith.extui %15 : i1 to i32
    %c0_i32_13 = arith.constant 0 : i32
    %17 = arith.cmpi ne, %16, %c0_i32_13 : i32
    scf.if %17 {
      %c0_14 = arith.constant 0 : index
      %c0_15 = arith.constant 0 : index
      %18 = vector.load %arg6[%c0_14, %c0_15] : memref<128x128xf32, #tpu.memory_space<vmem>>, vector<128x128xf32>
      %c0_16 = arith.constant 0 : index
      %c0_17 = arith.constant 0 : index
      %19 = vector.load %arg3[%c0_16, %c0_17] : memref<128x128xbf16, #tpu.memory_space<vmem>>, vector<128x128xbf16>
      %20 = arith.extf %19 : vector<128x128xbf16> to vector<128x128xf32>
      %cst_18 = arith.constant dense<0.000000e+00> : vector<128x128xf32>
      %21 = tpu.matmul %18, %20, %cst_18 {dimension_numbers = #tpu.dot_dimension_numbers<[1], [0], [0], [1], [0, 0, 1, 1], [], []>} : vector<128x128xf32>, vector<128x128xf32>, vector<128x128xf32> -> vector<128x128xf32>
      %22 = arith.truncf %21 : vector<128x128xf32> to vector<128x128xbf16>
      %c0_19 = arith.constant 0 : index
      %c0_20 = arith.constant 0 : index
      %23 = vector.load %arg4[%c0_19, %c0_20] : memref<128x128xbf16, #tpu.memory_space<vmem>>, vector<128x128xbf16>
      tpu.vector_store %arg4[%c0_19, %c0_20], %22 {strides = array<i32>} : memref<128x128xbf16, #tpu.memory_space<vmem>>, vector<128x128xbf16>,
      %c0_21 = arith.constant 0 : index
      %c0_22 = arith.constant 0 : index
      %24 = vector.load %arg7[%c0_21, %c0_22] : memref<1x128xf32, #tpu.memory_space<vmem>>, vector<1x128xf32>
      %cst_23 = arith.constant 9.99999996E-13 : f32
      %25 = vector.broadcast %cst_23 : f32 to vector<1x128xf32>
      %26 = arith.maximumf %24, %25 : vector<1x128xf32>
      %27 = tpu.reciprocal %26 {approx = true} : vector<1x128xf32> -> vector<1x128xf32>
      %c0_24 = arith.constant 0 : index
      %c0_25 = arith.constant 0 : index
      %28 = vector.load %arg5[%c0_24, %c0_25] : memref<1x128xf32, #tpu.memory_space<vmem>>, vector<1x128xf32>
      tpu.vector_store %arg5[%c0_24, %c0_25], %27 {strides = array<i32>} : memref<1x128xf32, #tpu.memory_space<vmem>>, vector<1x128xf32>,
    } else {
    }
    return
  }
  func.func @transform_0(%arg0: i32) -> (i32, i32) {
    %c0_i32 = arith.constant 0 : i32
    %c0_i32_0 = arith.constant 0 : i32
    return %arg0, %c0_i32 : i32, i32
  }
  func.func @transform_1(%arg0: i32) -> (i32, i32) {
    %c0_i32 = arith.constant 0 : i32
    %c0_i32_0 = arith.constant 0 : i32
    return %arg0, %c0_i32 : i32, i32
  }
  func.func @transform_2(%arg0: i32) -> (i32, i32) {
    %c0_i32 = arith.constant 0 : i32
    %c0_i32_0 = arith.constant 0 : i32
    %c0_i32_1 = arith.constant 0 : i32
    return %c0_i32, %c0_i32_0 : i32, i32
  }
  func.func @transform_3(%arg0: i32) -> (i32, i32) {
    %c0_i32 = arith.constant 0 : i32
    %c0_i32_0 = arith.constant 0 : i32
    %c0_i32_1 = arith.constant 0 : i32
    return %c0_i32, %c0_i32_0 : i32, i32
  }
  func.func @transform_4(%arg0: i32) -> (i32, i32) {
    %c0_i32 = arith.constant 0 : i32
    %c0_i32_0 = arith.constant 0 : i32
    %c0_i32_1 = arith.constant 0 : i32
    return %c0_i32, %c0_i32_0 : i32, i32
  }
}

</mosaic_0001>

<bundles_post_ra>
// kernel: tpu_custom_call.1
= control target key start
LH: loop header
LB: loop body
LE: loop exit
PB: predicated region body
PF: predicated region fallthrough
CT: control target
= control target key end

     0   :  { %10 = vsyncpa [#allocation5], 0  ;;  %s1591_s0 = inlined_call_operand.hbm [shape: bf16[256,128], index: 0, kind: input, shape index: {}]   ;;  %s1592_s1 = inlined_call_operand.hbm [shape: bf16[256,128], index: 1, kind: input, shape index: {}]   ;;  %s1593_s2 = inlined_call_operand.hbm [shape: bf16[128,128], index: 2, kind: input, shape index: {}]   ;;  %s1594_s3 = inlined_call_operand.hbm [shape: bf16[128,128], index: 3, kind: output, shape index: {0}]   ;;  %s1595_s4 = inlined_call_operand.hbm [shape: f32[1,128], index: 4, kind: output, shape index: {1}]  }
   0x1   :  { %12 = vsyncpa [#allocation5 + $0x1], 0 }
   0x2   :  { %13 = vsyncpa [#allocation8], 0 }
   0x3   :  { %15 = vsyncpa [#allocation8 + $0x1], 0 }
   0x4   :  { %16 = vsyncpa [#allocation6], 0 }
   0x5   :  { %17 = vsyncpa [#allocation12], 0  ;;  %s1406_s15 = smov 0   ;;  %s1408_s16 = smov 0  }
   0x6   :  { %s1410_s17 = smov 0   ;;  %s1412_s18 = smov 0  }
   0x7 LB: > { %s1425_s19 = sadd.s32 4294967295, %s1371_s18   ;;  %p43_p0 = scmp.ne.s32.totalorder %s1363_s16, %s1359_s15  ;;  %s1371_s18 = sphi %s1412_s18, %s1602_s18   ;;  %s1367_s17 = sphi %s1410_s17, %s1601_s17   ;;  %s1363_s16 = sphi %s1408_s16, %s1600_s16   ;;  %s1359_s15 = sphi %s1406_s15, %s1599_s15  }
   0x8   : > { %p44_p1 = scmp.eq.s32.totalorder %s1425_s19, 0  ;;  %p838_p2 = scmp.ge.s32.totalorder %s1371_s18, 1 }
   0x9   : > { %p143_p3 = scmp.lt.s32.totalorder %s1371_s18, 3  ;;  %p839_p4 = scmp.ne.s32.totalorder %s1425_s19, 0 }
   0xa   : > { %p1434_p5 = por %p44_p1, %p43_p0  ;;  %s154_s23 = sshll.u32 %s1593_s2, 4  ;;  %s155_s23 = int_to_ptr.hbm [resolvable:$true] %s154_s23 }
   0xb   : > { %p1441_p6 = pnand %p838_p2, %p143_p3  ;;  %s1373_s25 = smov [#allocation9]  }
   0xc   : > { %s156_s26 = sshll.u32 %s1373_s25, 4  ;;  %s1450_s27 = sadd.s32 1, %s1371_s18   ;;  %s157_s26 = int_to_ptr.vmem [resolvable:$true] %s156_s26 }
   0xd   : > { %p1115_p7 = pneg %p1441_p6  ;;  %s1374_s28 = smov 64  }
   0xe   : > { %s1375_s29 = smov 4   ;;  %s27_s30 = ssub.s32 %s1371_s18, %s1450_s27 }
   0xf   : > { %p1116_p8 = pnand %p1115_p7, %p44_p1  ;;  %s30_s5 = sadd.s32 1, %s1367_s17 }
  0x10   : > { %p28_p9 = scmp.eq.s32.totalorder %s27_s30, 0  ;;  %p37_p10 = scmp.ne.s32.totalorder %s1367_s17, %s1363_s16 }
  0x11   : > { %1118 = dma.hbm_to_vmem [thread:$0]  (!%p1116_p8), %s155_s23, 1024, %s157_s26, [#allocation8], %s1374_s28, %s1374_s28, %s1375_s29  }
  0x12   : > { %p38_p11 = scmp.eq.s32.totalorder %s1371_s18, 0  ;;  %p1127_p12 = scmp.lt.s32.totalorder %s1371_s18, 2 }
  0x13   : > { %s1463_s6 = scalar_select %p28_p9, %s1367_s17, %s30_s5  }
  0x14   : > { %p39_p13 = por %p38_p11, %p37_p10  ;;  %s170_s7 = sand.u32 1, %s1367_s17  }
  0x15   : > { %s1466_s8 = sshll.u32 %s170_s7, 6  ;;  %s923_s9 = sshll.u32 %s1371_s18, 6 }
  0x16   : > { %s179_s12 = scalar_lea.hbm %s1591_s0, %s923_s9  ;;  %s174_s13 = scalar_lea.vmem [#allocation4], %s1466_s8 }
  0x17   : > { %s182_s14 = sshll.u32 %s174_s13, 4  ;;  %s180_s15 = sshll.u32 %s179_s12, 4  ;;  %s183_s14 = int_to_ptr.vmem [resolvable:$true] %s182_s14  ;;  %s181_s15 = int_to_ptr.hbm [resolvable:$true] %s180_s15 }
  0x18   : > { %p1473_p0 = pnand %p1127_p12, %p39_p13  ;;  %s201_s25 = scalar_lea.hbm %s1592_s1, %s923_s9 }
  0x19   : > { %s202_s26 = sshll.u32 %s201_s25, 4  ;;  %s171_s30 = scalar_lea.sflag [#allocation5], %s170_s7  ;;  %s203_s26 = int_to_ptr.hbm [resolvable:$true] %s202_s26 }
  0x1a   : > { %s1205_s5 = sshra.s32 %s181_s15, 4  ;;  %p1209_p3 = pneg %p1473_p0  ;;  %s1206_s5 = int_to_ptr.hbm [resolvable:$true] %s1205_s5 }
  0x1b   : > { %s1207_s10 = scalar_lea.hbm %s1206_s5, 64  ;;  %s1212_s13 = scalar_lea.hbm %s1591_s0, 128 }
  0x1c   : > { %p1208_p2 = scmp.ne.s32.totalorder %s1206_s5, %s1207_s10  ;;  %p1213_p9 = scmp.lt.s32.totalorder %s1206_s5, %s1591_s0 }
  0x1d   : > { %p1214_p10 = scmp.lt.s32.totalorder %s1212_s13, %s1207_s10 }
  0x1e   : > { %p1210_p7 = pnand %p1209_p3, %p1208_p2 }
  0x1f   : > { %p1215_p11 = por %p1214_p10, %p1213_p9 }
  0x20   : > { %p1211_p8 = pneg %p1210_p7 }
  0x22   : > { %p1216_p12 = pnand %p1215_p11, %p1211_p8 }
  0x24   : > { %1219 = shalt.err (!%p1216_p12)
}
  0x25   : > { %1122 = dma.hbm_to_vmem [thread:$0]  (!%p1473_p0), %s181_s15, 1024, %s183_s14, %s171_s30, %s1374_s28, %s1374_s28, %s1375_s29  }
  0x26   : > { %s196_s7 = scalar_lea.vmem [#allocation7], %s1466_s8  ;;  %s192_s25 = sand.u32 1, %s1371_s18  }
  0x27   : > { %s204_s9 = sshll.u32 %s196_s7, 4  ;;  %s193_s11 = scalar_lea.sflag [#allocation8], %s192_s25  ;;  %s205_s9 = int_to_ptr.vmem [resolvable:$true] %s204_s9 }
  0x28   : > { %s1235_s5 = sshra.s32 %s203_s26, 4  ;;  %s1242_s22 = scalar_lea.hbm %s1592_s1, 128  ;;  %s1236_s5 = int_to_ptr.hbm [resolvable:$true] %s1235_s5 }
  0x29   : > { %s1237_s10 = scalar_lea.hbm %s1236_s5, 64  ;;  %p1243_p8 = scmp.lt.s32.totalorder %s1236_s5, %s1592_s1 }
  0x2a   : > { %p1238_p13 = scmp.ne.s32.totalorder %s1236_s5, %s1237_s10  ;;  %p1244_p9 = scmp.lt.s32.totalorder %s1242_s22, %s1237_s10 }
  0x2c   : > { %p1240_p2 = pnand %p1238_p13, %p1209_p3  ;;  %p1245_p10 = por %p1244_p9, %p1243_p8 }
  0x2e   : > { %p1241_p7 = pneg %p1240_p2 }
  0x30   : > { %p1246_p11 = pnand %p1245_p10, %p1241_p7 }
  0x32   : > { %1249 = shalt.err (!%p1246_p11)
}
  0x33   : > { %1125 = dma.hbm_to_vmem [thread:$0]  (!%p1473_p0), %s203_s26, 1024, %s205_s9, %s193_s11, %s1374_s28, %s1374_s28, %s1375_s29  }
  0x34   : > { %216 = sbr.rel (%p1441_p6) target bundleno = 722 (0x2d2), region = 32  ;;  %s218_s18 = sand.u32 (!%p1441_p6), 1, %s1363_s16  }
  0x35   : > { %s848_s8 = sshll.u32 (!%p1441_p6), %s218_s18, 6  ;;  %s219_s15 = scalar_lea.sflag (!%p1441_p6), [#allocation5], %s218_s18 }
  0x36   : > { %s1515_s30 = scalar_lea.vmem (!%p1441_p6), [#allocation4], %s848_s8 }
  0x39   : > { %1338 = dma.done.wait (%p1434_p5), %s219_s15, 1024  }
  0x3a   : > { %1340 = vsyncadd (%p1434_p5), %s219_s15, 4294966272  ;;  %s228_s21 = sand.u32 1, %s1425_s19   ;;  %s1522_s28 = scalar_lea.vmem [#allocation7], %s848_s8 }
  0x3b   : > { %s229_s7 = scalar_lea.sflag [#allocation8], %s228_s21 }
  0x3c   : > { %1342 = dma.done.wait (%p1434_p5), %s229_s7, 1024  }
  0x3d   : > { %1344 = vsyncadd (%p1434_p5), %s229_s7, 4294966272 }
  0x3e   : > { %1346 = dma.done.wait (%p44_p1), [#allocation8], 1024  }
  0x3f   : > { %1348 = vsyncadd (%p44_p1), [#allocation8], 4294966272  ;;  %268 = sbr.rel (%p839_p4) target bundleno = 86 (0x56), region = 48 }
  0x44   : > { %v1376_v0 = vmov 0.0  }
  0x45   : > { %269 = vst [vmem:[#allocation2 + $0x30] sm:$0xff] %v1376_v0 }
  0x46   : > { %270 = vst [vmem:[#allocation2] sm:$0xff] %v1376_v0 }
  0x47   : > { %271 = vst [vmem:[#allocation2 + $0x58] sm:$0xff] %v1376_v0 }
  0x48   : > { %272 = vst [vmem:[#allocation2 + $0x18] sm:$0xff] %v1376_v0 }
  0x49   : > { %273 = vst [vmem:[#allocation2 + $0x50] sm:$0xff] %v1376_v0 }
  0x4a   : > { %274 = vst [vmem:[#allocation2 + $0x68] sm:$0xff] %v1376_v0 }
  0x4b   : > { %275 = vst [vmem:[#allocation2 + $0x8] sm:$0xff] %v1376_v0 }
  0x4c   : > { %276 = vst [vmem:[#allocation2 + $0x48] sm:$0xff] %v1376_v0 }
  0x4d   : > { %277 = vst [vmem:[#allocation2 + $0x40] sm:$0xff] %v1376_v0 }
  0x4e   : > { %278 = vst [vmem:[#allocation2 + $0x20] sm:$0xff] %v1376_v0 }
  0x4f   : > { %279 = vst [vmem:[#allocation2 + $0x10] sm:$0xff] %v1376_v0 }
  0x50   : > { %280 = vst [vmem:[#allocation2 + $0x38] sm:$0xff] %v1376_v0 }
  0x51   : > { %281 = vst [vmem:[#allocation2 + $0x60] sm:$0xff] %v1376_v0 }
  0x52   : > { %282 = vst [vmem:[#allocation2 + $0x70] sm:$0xff] %v1376_v0 }
  0x53   : > { %283 = vst [vmem:[#allocation2 + $0x78] sm:$0xff] %v1376_v0 }
  0x54   : > { %284 = vst [vmem:[#allocation2 + $0x28] sm:$0xff] %v1376_v0 }
  0x55   : > { %285 = vst [vmem:[#allocation3] sm:$0x1] %v1376_v0 }
  0x56 PF: > { %v925_v1 = vld [vmem:[%s1515_s30] sm:$0xff]  ;;  %v926_v2 = vld [vmem:[%s1515_s30 + $0x8] sm:$0xff]  ;;  %v927_v3 = vld [vmem:[%s1515_s30 + $0x10] sm:$0xff]  ;;  %p916_p1 = scmp.ne.s32.totalorder %s1425_s19, 1 }
  0x57   : > { %382 = vxpose.xlu0.c.b16.start [1/8] %v925_v1, 128  ;;  %v928_v4 = vld [vmem:[%s1515_s30 + $0x18] sm:$0xff]  ;;  %v929_v5 = vld [vmem:[%s1515_s30 + $0x20] sm:$0xff]  ;;  %v930_v6 = vld [vmem:[%s1515_s30 + $0x28] sm:$0xff] }
  0x58   : > { %v940_v7 = vld [vmem:[%s1522_s28 + $0x38] sm:$0xff]  ;;  %v939_v8 = vld [vmem:[%s1522_s28 + $0x30] sm:$0xff]  ;;  %v938_v9 = vld [vmem:[%s1522_s28 + $0x28] sm:$0xff] }
  0x59   : > { %446 = vmatpush.bf16.msra.mxu0 %v940_v7  ;;  %1027 = vmatpush.bf16.msra.mxu1 %v940_v7  ;;  %v937_v10 = vld [vmem:[%s1522_s28 + $0x20] sm:$0xff]  ;;  %v931_v11 = vld [vmem:[%s1515_s30 + $0x30] sm:$0xff]  ;;  %v936_v12 = vld [vmem:[%s1522_s28 + $0x18] sm:$0xff] }
  0x5a   : > { %1028 = vmatpush.bf16.msra.mxu2 %v940_v7  ;;  %1029 = vmatpush.bf16.msra.mxu3 %v940_v7  ;;  %v935_v13 = vld [vmem:[%s1522_s28 + $0x10] sm:$0xff]  ;;  %v934_v14 = vld [vmem:[%s1522_s28 + $0x8] sm:$0xff]  ;;  %v933_v15 = vld [vmem:[%s1522_s28] sm:$0xff] }
  0x5b   : > { %v932_v16 = vld [vmem:[%s1515_s30 + $0x38] sm:$0xff]  ;;  %v318_v25 = vld [vmem:[#allocation2 + $0x30] sm:$0xff]  ;;  %v323_v40 = vld [vmem:[#allocation2 + $0x68] sm:$0xff] }
  0x5c   : > { %v319_v28 = vld [vmem:[#allocation2] sm:$0xff]  ;;  %v320_v31 = vld [vmem:[#allocation2 + $0x58] sm:$0xff]  ;;  %v322_v37 = vld [vmem:[#allocation2 + $0x50] sm:$0xff] }
  0x5d   : > { %447 = vmatpush.bf16.msra.mxu0 %v939_v8  ;;  %1030 = vmatpush.bf16.msra.mxu1 %v939_v8  ;;  %v321_v34 = vld [vmem:[#allocation2 + $0x18] sm:$0xff]  ;;  %v324_v43 = vld [vmem:[#allocation2 + $0x8] sm:$0xff] }
  0x5e   : > { %1031 = vmatpush.bf16.msra.mxu2 %v939_v8  ;;  %1032 = vmatpush.bf16.msra.mxu3 %v939_v8  ;;  %v286_v44 = vld [vmem:[%s1515_s30] sm:$0xff]   ;;  %v288_v47 = vld [vmem:[%s1515_s30 + $0x8] sm:$0xff]   ;;  %v290_v52 = vld [vmem:[%s1515_s30 + $0x10] sm:$0xff]  }
  0x5f   : > { %v528_v48 = vunpack.c.l.bf16 %v286_v44  ;;  %v529_v49 = vunpack.c.h.bf16 %v286_v44  ;;  %v530_v50 = vunpack.c.l.bf16 %v288_v47  ;;  %v325_v53 = vld [vmem:[#allocation2 + $0x48] sm:$0xff]  ;;  %v531_v54 = vunpack.c.h.bf16 %v288_v47  ;;  %v292_v60 = vld [vmem:[%s1515_s30 + $0x18] sm:$0xff]   ;;  %v331_v47 = vld [vmem:[#allocation2 + $0x70] sm:$0xff] }
  0x60   : > { %v532_v58 = vunpack.c.l.bf16 %v290_v52  ;;  %v533_v61 = vunpack.c.h.bf16 %v290_v52  ;;  %v534_v63 = vunpack.c.l.bf16 %v292_v60  ;;  %v294_v1 = vld [vmem:[%s1515_s30 + $0x20] sm:$0xff]  }
  0x61   : > { %448 = vmatpush.bf16.msra.mxu0 %v938_v9  ;;  %1033 = vmatpush.bf16.msra.mxu1 %v938_v9  ;;  %v544_v51 = vadd.f32 %v529_v49, %v528_v48  ;;  %v537_v7 = vunpack.c.h.bf16 %v294_v1  ;;  %v330_v44 = vld [vmem:[#allocation2 + $0x60] sm:$0xff] }
  0x62   : > { %1034 = vmatpush.bf16.msra.mxu2 %v938_v9  ;;  %1035 = vmatpush.bf16.msra.mxu3 %v938_v9  ;;  %v326_v9 = vld [vmem:[#allocation2 + $0x40] sm:$0xff] }
  0x63   : > { %v545_v55 = vadd.f32 %v544_v51, %v530_v50  ;;  %v332_v50 = vld [vmem:[#allocation2 + $0x78] sm:$0xff] }
  0x65   : > { %449 = vmatpush.bf16.msra.mxu0 %v937_v10  ;;  %1036 = vmatpush.bf16.msra.mxu1 %v937_v10  ;;  %v546_v59 = vadd.f32 %v545_v55, %v531_v54 }
  0x66   : > { %1037 = vmatpush.bf16.msra.mxu2 %v937_v10  ;;  %1038 = vmatpush.bf16.msra.mxu3 %v937_v10 }
  0x67   : > { %383 = vxpose.xlu0.c.b16.cont [2/8] %v926_v2, 128  ;;  %v547_v62 = vadd.f32 %v546_v59, %v532_v58  ;;  %v535_v2 = vunpack.c.h.bf16 %v292_v60 }
  0x69   : > { %450 = vmatpush.bf16.msra.mxu0 %v936_v12  ;;  %1039 = vmatpush.bf16.msra.mxu1 %v936_v12  ;;  %v548_v0 = vadd.f32 %v547_v62, %v533_v61 }
  0x6a   : > { %1040 = vmatpush.bf16.msra.mxu2 %v936_v12  ;;  %1041 = vmatpush.bf16.msra.mxu3 %v936_v12  ;;  %v298_v12 = vld [vmem:[%s1515_s30 + $0x30] sm:$0xff]  }
  0x6d   : > { %451 = vmatpush.bf16.msra.mxu0 %v935_v13  ;;  %1042 = vmatpush.bf16.msra.mxu1 %v935_v13 }
  0x6e   : > { %1043 = vmatpush.bf16.msra.mxu2 %v935_v13  ;;  %1044 = vmatpush.bf16.msra.mxu3 %v935_v13 }
  0x71   : > { %452 = vmatpush.bf16.msra.mxu0 %v934_v14  ;;  %1045 = vmatpush.bf16.msra.mxu1 %v934_v14 }
  0x72   : > { %1046 = vmatpush.bf16.msra.mxu2 %v934_v14  ;;  %1047 = vmatpush.bf16.msra.mxu3 %v934_v14 }
  0x75   : > { %453 = vmatpush.bf16.msra.mxu0 %v933_v15  ;;  %1048 = vmatpush.bf16.msra.mxu1 %v933_v15 }
  0x76   : > { %1049 = vmatpush.bf16.msra.mxu2 %v933_v15  ;;  %1050 = vmatpush.bf16.msra.mxu3 %v933_v15 }
  0x77   : > { %384 = vxpose.xlu0.c.b16.cont [3/8] %v927_v3, 128  ;;  %v549_v3 = vadd.f32 %v548_v0, %v534_v63 }
  0x87   : > { %385 = vxpose.xlu0.c.b16.cont [4/8] %v928_v4, 128  ;;  %v536_v4 = vunpack.c.l.bf16 %v294_v1 }
  0x97   : > { %386 = vxpose.xlu0.c.b16.cont [5/8] %v929_v5, 128  ;;  %v550_v5 = vadd.f32 %v549_v3, %v535_v2 }
  0x99   : > { %v551_v8 = vadd.f32 %v550_v5, %v536_v4 }
  0xa7   : > { %387 = vxpose.xlu0.c.b16.cont [6/8] %v930_v6, 128  ;;  %v296_v6 = vld [vmem:[%s1515_s30 + $0x28] sm:$0xff]  }
  0xa8   : > { %v538_v10 = vunpack.c.l.bf16 %v296_v6  ;;  %v539_v15 = vunpack.c.h.bf16 %v296_v6 }
  0xb7   : > { %388 = vxpose.xlu0.c.b16.cont [7/8] %v931_v11, 128  ;;  %v552_v11 = vadd.f32 %v551_v8, %v537_v7 }
  0xc7   : > { %389 = vxpose.xlu0.c.b16.end [8/8] %v932_v16, 128  ;;  %v553_v16 = vadd.f32 %v552_v11, %v538_v10 }
 0x103   : > { %v390_v17 = vpop.trf.xlu0 }
 0x104   : > { %454 = vmatmul.bf16.vlgmr.msra.gmra.mxu0 %v390_v17  ;;  %v540_v17 = vunpack.c.l.bf16 %v298_v12 }
 0x113   : > { %v391_v18 = vpop.trf.xlu0 }
 0x114   : > { %459 = vmatmul.bf16.gmra.mxu0 %v391_v18  ;;  %v554_v18 = vadd.f32 %v553_v16, %v539_v15 }
 0x123   : > { %v392_v19 = vpop.trf.xlu0 }
 0x124   : > { %464 = vmatmul.bf16.vlgmr.msra.gmra.mxu1 %v392_v19  ;;  %v300_v19 = vld [vmem:[%s1515_s30 + $0x38] sm:$0xff]  }
 0x133   : > { %v393_v20 = vpop.trf.xlu0 }
 0x134   : > { %469 = vmatmul.bf16.gmra.mxu1 %v393_v20  ;;  %v541_v20 = vunpack.c.h.bf16 %v298_v12 }
 0x143   : > { %v394_v21 = vpop.trf.xlu0 }
 0x144   : > { %474 = vmatmul.bf16.vlgmr.msra.gmra.mxu2 %v394_v21  ;;  %v555_v21 = vadd.f32 %v554_v18, %v540_v17 }
 0x153   : > { %v395_v22 = vpop.trf.xlu0 }
 0x154   : > { %479 = vmatmul.bf16.gmra.mxu2 %v395_v22  ;;  %v327_v22 = vld [vmem:[#allocation2 + $0x20] sm:$0xff] }
 0x163   : > { %v396_v23 = vpop.trf.xlu0 }
 0x164   : > { %484 = vmatmul.bf16.vlgmr.msra.gmra.mxu3 %v396_v23  ;;  %v542_v23 = vunpack.c.l.bf16 %v300_v19 }
 0x173   : > { %v397_v24 = vpop.trf.xlu0 }
 0x174   : > { %489 = vmatmul.bf16.gmra.mxu3 %v397_v24  ;;  %v556_v24 = vadd.f32 %v555_v21, %v541_v20 }
 0x181   : > { %v455_v26 = vpop.f32.mrf.mxu0 }
 0x182   : > { %v495_v27 = vadd.f32 %v455_v26, %v318_v25 }
 0x184   : > { %511 = vst [vmem:[#allocation2 + $0x30] sm:$0xff] %v495_v27  ;;  %v543_v27 = vunpack.c.h.bf16 %v300_v19 }
 0x189   : > { %v457_v29 = vpop.f32.mrf.mxu0 }
 0x18a   : > { %v496_v30 = vadd.f32 %v457_v29, %v319_v28  ;;  %v557_v28 = vadd.f32 %v556_v24, %v542_v23 }
 0x18c   : > { %512 = vst [vmem:[#allocation2] sm:$0xff] %v496_v30  ;;  %v558_v29 = vadd.f32 %v557_v28, %v543_v27 }
 0x18e   : > { %v559_v30 = vrot.slane %v558_v29, 4 }
 0x191   : > { %v460_v32 = vpop.f32.mrf.mxu0 }
 0x192   : > { %v497_v33 = vadd.f32 %v460_v32, %v320_v31  ;;  %v328_v31 = vld [vmem:[#allocation2 + $0x10] sm:$0xff]  ;;  %v560_v32 = vadd.f32 %v559_v30, %v558_v29 }
 0x194   : > { %513 = vst [vmem:[#allocation2 + $0x58] sm:$0xff] %v497_v33 }
 0x199   : > { %v462_v35 = vpop.f32.mrf.mxu0 }
 0x19a   : > { %v498_v36 = vadd.f32 %v462_v35, %v321_v34  ;;  %v561_v35 = vrot.slane %v560_v32, 2 }
 0x19c   : > { %514 = vst [vmem:[#allocation2 + $0x18] sm:$0xff] %v498_v36  ;;  %v562_v36 = vadd.f32 %v561_v35, %v560_v32 }
 0x1a1   : > { %v465_v38 = vpop.f32.mrf.mxu1 }
 0x1a2   : > { %v499_v39 = vadd.f32 %v465_v38, %v322_v37  ;;  %v563_v37 = vrot.slane %v562_v36, 1  ;;  %v329_v38 = vld [vmem:[#allocation2 + $0x38] sm:$0xff] }
 0x1a4   : > { %515 = vst [vmem:[#allocation2 + $0x50] sm:$0xff] %v499_v39  ;;  %v564_v39 = vadd.f32 %v563_v37, %v562_v36 }
 0x1a9   : > { %v467_v41 = vpop.f32.mrf.mxu1 }
 0x1aa   : > { %v500_v42 = vadd.f32 %v467_v41, %v323_v40  ;;  %v527_v41 = vld [vmem:[#allocation3] sm:$0x1] }
 0x1ac   : > { %516 = vst [vmem:[#allocation2 + $0x68] sm:$0xff] %v500_v42 }
 0x1b1   : > { %v470_v45 = vpop.f32.mrf.mxu1 }
 0x1b2   : > { %v501_v46 = vadd.f32 %v470_v45, %v324_v43  ;;  %v565_v43 = vadd.f32 %v564_v39, %v527_v41 }
 0x1b4   : > { %517 = vst [vmem:[#allocation2 + $0x8] sm:$0xff] %v501_v46 }
 0x1b5   : > { %566 = vst [vmem:[#allocation3] sm:$0x1] %v565_v43 }
 0x1b9   : > { %v472_v56 = vpop.f32.mrf.mxu1 }
 0x1ba   : > { %v502_v57 = vadd.f32 %v472_v56, %v325_v53  ;;  %v333_v53 = vld [vmem:[#allocation2 + $0x28] sm:$0xff] }
 0x1bc   : > { %518 = vst [vmem:[#allocation2 + $0x48] sm:$0xff] %v502_v57 }
 0x1c7   : > { %v475_v13 = vpop.f32.mrf.mxu2 }
 0x1c8   : > { %v503_v14 = vadd.f32 %v475_v13, %v326_v9 }
 0x1ca   : > { %519 = vst [vmem:[#allocation2 + $0x40] sm:$0xff] %v503_v14 }
 0x1cf   : > { %v477_v25 = vpop.f32.mrf.mxu2 }
 0x1d0   : > { %v504_v26 = vadd.f32 %v477_v25, %v327_v22 }
 0x1d2   : > { %520 = vst [vmem:[#allocation2 + $0x20] sm:$0xff] %v504_v26 }
 0x1d7   : > { %v480_v33 = vpop.f32.mrf.mxu2 }
 0x1d8   : > { %v505_v34 = vadd.f32 %v480_v33, %v328_v31 }
 0x1da   : > { %521 = vst [vmem:[#allocation2 + $0x10] sm:$0xff] %v505_v34 }
 0x1df   : > { %v482_v40 = vpop.f32.mrf.mxu2 }
 0x1e0   : > { %v506_v42 = vadd.f32 %v482_v40, %v329_v38 }
 0x1e2   : > { %522 = vst [vmem:[#allocation2 + $0x38] sm:$0xff] %v506_v42 }
 0x1e7   : > { %v485_v45 = vpop.f32.mrf.mxu3 }
 0x1e8   : > { %v507_v46 = vadd.f32 %v485_v45, %v330_v44 }
 0x1ea   : > { %523 = vst [vmem:[#allocation2 + $0x60] sm:$0xff] %v507_v46 }
 0x1ef   : > { %v487_v48 = vpop.f32.mrf.mxu3 }
 0x1f0   : > { %v508_v49 = vadd.f32 %v487_v48, %v331_v47 }
 0x1f2   : > { %524 = vst [vmem:[#allocation2 + $0x70] sm:$0xff] %v508_v49 }
 0x1f7   : > { %v490_v51 = vpop.f32.mrf.mxu3 }
 0x1f8   : > { %v509_v52 = vadd.f32 %v490_v51, %v332_v50 }
 0x1fa   : > { %525 = vst [vmem:[#allocation2 + $0x78] sm:$0xff] %v509_v52 }
 0x1fe   : > { %570 = sbr.rel (%p916_p1) target bundleno = 711 (0x2c7), region = 52 }
 0x1ff   : > { %v492_v54 = vpop.f32.mrf.mxu3 }
 0x200   : > { %v510_v55 = vadd.f32 %v492_v54, %v333_v53 }
 0x202   : > { %526 = vst [vmem:[#allocation2 + $0x28] sm:$0xff] %v510_v55 }
 0x203   : > { %v1019_v56 = vld [vmem:[#allocation9 + $0x38] sm:$0xff]   ;;  %v1018_v57 = vld [vmem:[#allocation9 + $0x30] sm:$0xff]   ;;  %v1017_v61 = vld [vmem:[#allocation9 + $0x28] sm:$0xff]  }
 0x204   : > { %v972_v58 = vunpack.c.h.bf16 %v1019_v56  ;;  %v971_v59 = vunpack.c.l.bf16 %v1019_v56  ;;  %v968_v60 = vunpack.c.h.bf16 %v1018_v57  ;;  %v967_v62 = vunpack.c.l.bf16 %v1018_v57  ;;  %v1016_v0 = vld [vmem:[#allocation9 + $0x20] sm:$0xff]   ;;  %v1015_v3 = vld [vmem:[#allocation9 + $0x18] sm:$0xff]   ;;  %v1014_v6 = vld [vmem:[#allocation9 + $0x10] sm:$0xff]  }
 0x205   : > { %v964_v63 = vunpack.c.h.bf16 %v1017_v61  ;;  %v963_v1 = vunpack.c.l.bf16 %v1017_v61  ;;  %v960_v2 = vunpack.c.h.bf16 %v1016_v0  ;;  %v959_v4 = vunpack.c.l.bf16 %v1016_v0  ;;  %v1013_v9 = vld [vmem:[#allocation9 + $0x8] sm:$0xff]   ;;  %v942_v12 = vld [vmem:[#allocation9] sm:$0xff]   ;;  %v573_v24 = vld [vmem:[#allocation2 + $0x58] sm:$0xff] }
 0x206   : > { %619 = vmatpush.msra.mxu0 %v972_v58  ;;  %1051 = vmatpush.msra.mxu1 %v972_v58  ;;  %v956_v5 = vunpack.c.h.bf16 %v1015_v3  ;;  %v955_v7 = vunpack.c.l.bf16 %v1015_v3  ;;  %v952_v8 = vunpack.c.h.bf16 %v1014_v6  ;;  %v951_v10 = vunpack.c.l.bf16 %v1014_v6  ;;  %v571_v16 = vld [vmem:[#allocation2 + $0x30] sm:$0xff]  ;;  %v579_v18 = vld [vmem:[#allocation2 + $0x40] sm:$0xff]  ;;  %v576_v21 = vld [vmem:[#allocation2 + $0x68] sm:$0xff] }
 0x207   : > { %1052 = vmatpush.msra.mxu2 %v972_v58  ;;  %1053 = vmatpush.msra.mxu3 %v972_v58  ;;  %v948_v11 = vunpack.c.h.bf16 %v1013_v9  ;;  %v947_v13 = vunpack.c.l.bf16 %v1013_v9  ;;  %v944_v14 = vunpack.c.h.bf16 %v942_v12  ;;  %v943_v15 = vunpack.c.l.bf16 %v942_v12  ;;  %v575_v17 = vld [vmem:[#allocation2 + $0x50] sm:$0xff]  ;;  %v583_v19 = vld [vmem:[#allocation2 + $0x60] sm:$0xff]  ;;  %v577_v25 = vld [vmem:[#allocation2 + $0x8] sm:$0xff] }
 0x208   : > { %620 = vmatpush.msra.mxu0 %v971_v59  ;;  %1054 = vmatpush.msra.mxu1 %v971_v59  ;;  %v572_v20 = vld [vmem:[#allocation2] sm:$0xff]  ;;  %v584_v23 = vld [vmem:[#allocation2 + $0x70] sm:$0xff]  ;;  %v585_v27 = vld [vmem:[#allocation2 + $0x78] sm:$0xff] }
 0x209   : > { %1055 = vmatpush.msra.mxu2 %v971_v59  ;;  %1056 = vmatpush.msra.mxu3 %v971_v59  ;;  %v580_v22 = vld [vmem:[#allocation2 + $0x20] sm:$0xff]  ;;  %v581_v26 = vld [vmem:[#allocation2 + $0x10] sm:$0xff]  ;;  %v574_v28 = vld [vmem:[#allocation2 + $0x18] sm:$0xff] }
 0x20a   : > { %621 = vmatpush.msra.mxu0 %v968_v60  ;;  %1057 = vmatpush.msra.mxu1 %v968_v60  ;;  %v578_v29 = vld [vmem:[#allocation2 + $0x48] sm:$0xff]  ;;  %v582_v30 = vld [vmem:[#allocation2 + $0x38] sm:$0xff]  ;;  %v716_v32 = vld [vmem:[#allocation3] sm:$0x1] }
 0x20b   : > { %1058 = vmatpush.msra.mxu2 %v968_v60  ;;  %1059 = vmatpush.msra.mxu3 %v968_v60  ;;  %v586_v31 = vld [vmem:[#allocation2 + $0x28] sm:$0xff]  ;;  %v717_v33 = vmax.f32 %v716_v32, 1e-12 }
 0x20c   : > { %622 = vmatpush.msra.mxu0 %v967_v62  ;;  %1060 = vmatpush.msra.mxu1 %v967_v62 }
 0x20d   : > { %1061 = vmatpush.msra.mxu2 %v967_v62  ;;  %1062 = vmatpush.msra.mxu3 %v967_v62  ;;  %1173 = vrcp.f32 %v717_v33 }
 0x20e   : > { %623 = vmatpush.msra.mxu0 %v964_v63  ;;  %1063 = vmatpush.msra.mxu1 %v964_v63 }
 0x20f   : > { %1064 = vmatpush.msra.mxu2 %v964_v63  ;;  %1065 = vmatpush.msra.mxu3 %v964_v63 }
 0x210   : > { %624 = vmatpush.msra.mxu0 %v963_v1  ;;  %1066 = vmatpush.msra.mxu1 %v963_v1 }
 0x211   : > { %1067 = vmatpush.msra.mxu2 %v963_v1  ;;  %1068 = vmatpush.msra.mxu3 %v963_v1 }
 0x212   : > { %625 = vmatpush.msra.mxu0 %v960_v2  ;;  %1069 = vmatpush.msra.mxu1 %v960_v2 }
 0x213   : > { %1070 = vmatpush.msra.mxu2 %v960_v2  ;;  %1071 = vmatpush.msra.mxu3 %v960_v2  ;;  %v1174_v36 = vpop.eup %1173 }
 0x214   : > { %626 = vmatpush.msra.mxu0 %v959_v4  ;;  %1072 = vmatpush.msra.mxu1 %v959_v4  ;;  %719 = vst [vmem:[#allocation11] sm:$0x1] %v1174_v36 }
 0x215   : > { %1073 = vmatpush.msra.mxu2 %v959_v4  ;;  %1074 = vmatpush.msra.mxu3 %v959_v4 }
 0x216   : > { %627 = vmatpush.msra.mxu0 %v956_v5  ;;  %1075 = vmatpush.msra.mxu1 %v956_v5 }
 0x217   : > { %1076 = vmatpush.msra.mxu2 %v956_v5  ;;  %1077 = vmatpush.msra.mxu3 %v956_v5 }
 0x218   : > { %628 = vmatpush.msra.mxu0 %v955_v7  ;;  %1078 = vmatpush.msra.mxu1 %v955_v7 }
 0x219   : > { %1079 = vmatpush.msra.mxu2 %v955_v7  ;;  %1080 = vmatpush.msra.mxu3 %v955_v7 }
 0x21a   : > { %629 = vmatpush.msra.mxu0 %v952_v8  ;;  %1081 = vmatpush.msra.mxu1 %v952_v8 }
 0x21b   : > { %1082 = vmatpush.msra.mxu2 %v952_v8  ;;  %1083 = vmatpush.msra.mxu3 %v952_v8 }
 0x21c   : > { %630 = vmatpush.msra.mxu0 %v951_v10  ;;  %1084 = vmatpush.msra.mxu1 %v951_v10 }
 0x21d   : > { %1085 = vmatpush.msra.mxu2 %v951_v10  ;;  %1086 = vmatpush.msra.mxu3 %v951_v10 }
 0x21e   : > { %631 = vmatpush.msra.mxu0 %v948_v11  ;;  %1087 = vmatpush.msra.mxu1 %v948_v11 }
 0x21f   : > { %1088 = vmatpush.msra.mxu2 %v948_v11  ;;  %1089 = vmatpush.msra.mxu3 %v948_v11 }
 0x220   : > { %632 = vmatpush.msra.mxu0 %v947_v13  ;;  %1090 = vmatpush.msra.mxu1 %v947_v13 }
 0x221   : > { %1091 = vmatpush.msra.mxu2 %v947_v13  ;;  %1092 = vmatpush.msra.mxu3 %v947_v13 }
 0x222   : > { %633 = vmatpush.msra.mxu0 %v944_v14  ;;  %1093 = vmatpush.msra.mxu1 %v944_v14 }
 0x223   : > { %1094 = vmatpush.msra.mxu2 %v944_v14  ;;  %1095 = vmatpush.msra.mxu3 %v944_v14 }
 0x224   : > { %634 = vmatpush.msra.mxu0 %v943_v15  ;;  %1096 = vmatpush.msra.mxu1 %v943_v15 }
 0x225   : > { %1097 = vmatpush.msra.mxu2 %v943_v15  ;;  %1098 = vmatpush.msra.mxu3 %v943_v15 }
 0x226   : > { %635 = vmatmul.f32.vlgmr.msra.gmra.mxu0 %v571_v16  ;;  %647 = vmatmul.f32.vlgmr.msra.gmra.mxu1 %v575_v17 }
 0x227   : > { %659 = vmatmul.f32.vlgmr.msra.gmra.mxu2 %v579_v18  ;;  %671 = vmatmul.f32.vlgmr.msra.gmra.mxu3 %v583_v19 }
 0x22e   : > { %638 = vmatmul.f32.gmra.mxu0 %v572_v20  ;;  %650 = vmatmul.f32.gmra.mxu1 %v576_v21 }
 0x22f   : > { %662 = vmatmul.f32.gmra.mxu2 %v580_v22  ;;  %674 = vmatmul.f32.gmra.mxu3 %v584_v23 }
 0x236   : > { %641 = vmatmul.f32.gmra.mxu0 %v573_v24  ;;  %653 = vmatmul.f32.gmra.mxu1 %v577_v25 }
 0x237   : > { %665 = vmatmul.f32.gmra.mxu2 %v581_v26  ;;  %677 = vmatmul.f32.gmra.mxu3 %v585_v27 }
 0x23e   : > { %644 = vmatmul.f32.gmra.mxu0 %v574_v28  ;;  %656 = vmatmul.f32.gmra.mxu1 %v578_v29 }
 0x23f   : > { %668 = vmatmul.f32.gmra.mxu2 %v582_v30  ;;  %680 = vmatmul.f32.gmra.mxu3 %v586_v31 }
 0x2a3   : > { %v636_v34 = vpop.f32.mrf.mxu0  ;;  %v648_v35 = vpop.f32.mrf.mxu1 }
 0x2aa   : > { %v660_v37 = vpop.f32.mrf.mxu2  ;;  %v672_v38 = vpop.f32.mrf.mxu3 }
 0x2ab   : > { %v639_v39 = vpop.f32.mrf.mxu0  ;;  %v651_v40 = vpop.f32.mrf.mxu1 }
 0x2ac   : > { %v976_v41 = vpack.c.bf16 %v639_v39, %v636_v34  ;;  %v986_v42 = vpack.c.bf16 %v651_v40, %v648_v35 }
 0x2ae   : > { %977 = vst [vmem:[#allocation10] sm:$0xff] %v976_v41  }
 0x2af   : > { %1021 = vst [vmem:[#allocation10 + $0x10] sm:$0xff] %v986_v42  }
 0x2b2   : > { %v663_v43 = vpop.f32.mrf.mxu2  ;;  %v675_v44 = vpop.f32.mrf.mxu3 }
 0x2b3   : > { %v996_v45 = vpack.c.bf16 %v663_v43, %v660_v37  ;;  %v1006_v46 = vpack.c.bf16 %v675_v44, %v672_v38  ;;  %v642_v47 = vpop.f32.mrf.mxu0  ;;  %v654_v48 = vpop.f32.mrf.mxu1 }
 0x2b5   : > { %1023 = vst [vmem:[#allocation10 + $0x20] sm:$0xff] %v996_v45  }
 0x2b6   : > { %1025 = vst [vmem:[#allocation10 + $0x30] sm:$0xff] %v1006_v46  }
 0x2ba   : > { %v666_v49 = vpop.f32.mrf.mxu2  ;;  %v678_v50 = vpop.f32.mrf.mxu3 }
 0x2bb   : > { %v645_v51 = vpop.f32.mrf.mxu0  ;;  %v657_v52 = vpop.f32.mrf.mxu1 }
 0x2bc   : > { %v981_v53 = vpack.c.bf16 %v645_v51, %v642_v47  ;;  %v991_v54 = vpack.c.bf16 %v657_v52, %v654_v48 }
 0x2be   : > { %1020 = vst [vmem:[#allocation10 + $0x8] sm:$0xff] %v981_v53  }
 0x2bf   : > { %1022 = vst [vmem:[#allocation10 + $0x18] sm:$0xff] %v991_v54  }
 0x2c2   : > { %v669_v55 = vpop.f32.mrf.mxu2  ;;  %v681_v56 = vpop.f32.mrf.mxu3 }
 0x2c3   : > { %v1001_v57 = vpack.c.bf16 %v669_v55, %v666_v49  ;;  %v1011_v58 = vpack.c.bf16 %v681_v56, %v678_v50 }
 0x2c5   : > { %1024 = vst [vmem:[#allocation10 + $0x28] sm:$0xff] %v1001_v57  }
 0x2c6   : > { %1026 = vst [vmem:[#allocation10 + $0x38] sm:$0xff] %v1011_v58  }
 0x2c7 PF: > { %p1129_p4 = scmp.eq.s32.totalorder %s1425_s19, 1  ;;  %s1377_s20 = smov [#allocation10]  }
 0x2c8   : > { %s725_s24 = sshll.u32 %s1377_s20, 4  ;;  %s727_s9 = sshll.u32 %s1594_s3, 4  ;;  %s726_s24 = int_to_ptr.vmem [resolvable:$true] %s725_s24  ;;  %s728_s9 = int_to_ptr.hbm [resolvable:$true] %s727_s9 }
 0x2c9   : > { %s1378_s25 = smov 64   ;;  %s1379_s11 = smov 4  }
 0x2ca   : > { %1108 = dma.vmem_to_hbm [thread:$0]  (%p1129_p4), %s726_s24, 1024, %s728_s9, [#allocation6], %s1378_s25, %s1378_s25, %s1379_s11  }
 0x2cb   : > { %s742_s12 = sshll.u32 %s1595_s4, 4  ;;  %s1380_s13 = smov [#allocation11]   ;;  %s743_s12 = int_to_ptr.hbm [resolvable:$true] %s742_s12 }
 0x2cc   : > { %s740_s22 = sshll.u32 %s1380_s13, 4  ;;  %s741_s22 = int_to_ptr.vmem [resolvable:$true] %s740_s22 }
 0x2cd   : > { %1110 = dma.vmem_to_hbm [thread:$0]  (%p1129_p4), %s741_s22, 16, %s743_s12, [#allocation12]  }
 0x2ce   : > { %1350 = dma.done.wait (%p1129_p4), [#allocation6], 1024  }
 0x2cf   : > { %1352 = vsyncadd (%p1129_p4), [#allocation6], 4294966272 }
 0x2d0   : > { %1354 = dma.done.wait (%p1129_p4), [#allocation12], 16  }
 0x2d1   : > { %1356 = vsyncadd (%p1129_p4), [#allocation12], 4294967280 }
 0x2d2 PF: > { %p20_p5 = scmp.ge.s32.totalorder %s1450_s27, 4   ;;  %s1599_s15 = smov %s1363_s16 }
 0x2d3   : > { %s1600_s16 = smov %s1367_s17  ;;  %s1601_s17 = smov %s1463_s6 }
 0x2d4   : > { %s1602_s18 = smov %s1450_s27  ;;  %22 = sbr.rel (!%p20_p5) target bundleno = 7 (0x7), region = 102 }
 0x2d9   :  { %761 = vsyncpa [#allocation5], 1 }
 0x2da   :  { %763 = vsyncpa [#allocation5 + $0x1], 1 }
 0x2db   :  { %764 = vsyncpa [#allocation8], 1 }
 0x2dc   :  { %766 = vsyncpa [#allocation8 + $0x1], 1 }
 0x2dd   :  { %767 = vsyncpa [#allocation6], 1 }
 0x2de   :  { %769 = vsyncpa [#allocation6 + $0x1], 1 }
 0x2df   :  { %770 = vsyncpa [#allocation12], 1 }

</bundles_post_ra>
